<compile_context>
chip_gen: v5e
topology: v5e:2x2
jax: 0.10.0
libtpu: 0.0.40
codegen_flags: <defaults>
</compile_context>

<pallas_src>
import jax
import jax.numpy as jnp
from jax.experimental import pallas as pl
from jax.experimental.pallas import tpu as pltpu


# ----------------------------------------------------------------------------
# Fused kernel: attention pooling + encoder fc + MLP + all heads
# ----------------------------------------------------------------------------
def _app_kernel(src_ref, w_att_ref, b_att_ref, w_fc_ref, b_fc_ref, *refs):
    *w_refs, out_ref = refs            # 22 weight/bias refs, then the output slab

    # ---- BERTEncoder head: attention pooling over the sequence --------------
    src = src_ref[...]                                   # [TB, S, 768]
    w_att = w_att_ref[...]                               # [1, 768]
    # attention scores (matvec over D); bias is a scalar read from SMEM
    scores = jnp.sum(src * w_att[None, :, :], axis=-1) + b_att_ref[0, 0]   # [TB, S]
    # softmax over the sequence axis (dim=1 in the PyTorch code)
    m = jnp.max(scores, axis=1, keepdims=True)
    e = jnp.exp(scores - m)
    wt = e * pl.reciprocal(jnp.sum(e, axis=1, keepdims=True), approx=True)  # [TB, S]
    # weighted pool: contract S on the MXU (batched matmul with a unit q dim)
    pooled = jnp.einsum("bqs,bsd->bqd", wt[:, None, :], src,
                        preferred_element_type=jnp.float32)[:, 0, :]        # [TB, 768]
    # encoder fc: 768 -> embedding_size (torch.squeeze(dim=1) is implicit)
    h = (jnp.dot(pooled, w_fc_ref[...], preferred_element_type=jnp.float32)
         + b_fc_ref[...])                                 # [TB, emb]

    # ---- fully_connected: (Linear + ReLU) x 7 -------------------------------
    n_mlp = len(w_refs) // 2 - 4        # remaining pairs: fc2, mbti, ocean, heads
    i = 0
    for _ in range(n_mlp):
        h = jnp.maximum(
            jnp.dot(h, w_refs[i][...], preferred_element_type=jnp.float32)
            + w_refs[i + 1][...], 0.0)
        i += 2

    # pers = fc2(relu(fully_connected(x)))   (h >= 0 already; extra relu is a no-op)
    pers = (jnp.dot(h, w_refs[i][...], preferred_element_type=jnp.float32)
            + w_refs[i + 1][...])
    i += 2
    pers_r = jnp.maximum(pers, 0.0)

    # mbti = mbti_classifier(relu(pers))
    mbti = (jnp.dot(pers_r, w_refs[i][...], preferred_element_type=jnp.float32)
            + w_refs[i + 1][...])
    i += 2

    # OCEAN = relu(OCEAN_layer(relu(pers)))
    ocean = jnp.maximum(
        jnp.dot(pers_r, w_refs[i][...], preferred_element_type=jnp.float32)
        + w_refs[i + 1][...], 0.0)
    i += 2

    # 5 OCEAN heads fused into a single [ocean_size, 10] matmul
    logits = (jnp.dot(ocean, w_refs[i][...], preferred_element_type=jnp.float32)
              + w_refs[i + 1][...])

    # ---- one lane-dense output slab: [pers | mbti | 10 logits | zero pad] ----
    used = pers.shape[1] + mbti.shape[1] + logits.shape[1]
    parts = [pers, mbti, logits]
    if out_ref.shape[1] > used:
        parts.append(jnp.zeros((pers.shape[0], out_ref.shape[1] - used),
                               jnp.float32))
    out_ref[...] = jnp.concatenate(parts, axis=1)


# ----------------------------------------------------------------------------
# Wrapper
# ----------------------------------------------------------------------------
def _pick_batch_tile(B, S, D, bytes_budget=12 * 1024 * 1024):
    """Batch tile for the src block: double-buffered tile must stay well under
    the v7x scoped-VMEM budget; tile must be == B or a multiple of 8 dividing B
    (output sublane rule)."""
    max_tb = max(1, bytes_budget // (2 * S * D * 4))
    if B <= max_tb:
        return B
    tb = (max_tb // 8) * 8
    while tb >= 8:
        if B % tb == 0:
            return tb
        tb -= 8
    return B  # fallback: whole batch in one block


def app_forward(params, hidden_states):
    """hidden_states: encoder last_hidden_state, [B, S, 768] float32."""
    B, S, D = hidden_states.shape
    pers_dim = params["fc2"][0].shape[1]
    mbti_dim = params["mbti"][0].shape[1]
    n_logits = params["ocean_heads"][0].shape[1]          # 10 = 5 heads x 2
    used = pers_dim + mbti_dim + n_logits
    slab = max(128, pl.cdiv(used, 128) * 128)              # lane-dense output width

    # flatten the head parameters in the order the kernel consumes them
    flat = []
    for w, b in params["mlp"]:
        flat += [w, b]
    for name in ("fc2", "mbti", "ocean", "ocean_heads"):
        w, b = params[name]
        flat += [w, b]

    TB = _pick_batch_tile(B, S, D)
    grid = (B // TB,)

    def _bcast_spec(shape):
        nd = len(shape)
        return pl.BlockSpec(shape, lambda b, _nd=nd: (0,) * _nd)

    in_specs = [
        pl.BlockSpec((TB, S, D), lambda b: (b, 0, 0)),                  # src tile
        _bcast_spec(params["att_w"].shape),                              # [1, 768]
        pl.BlockSpec(memory_space=pltpu.MemorySpace.SMEM),               # b_att scalar
        _bcast_spec(params["enc_fc_w"].shape),
        _bcast_spec(params["enc_fc_b"].shape),
    ] + [_bcast_spec(p.shape) for p in flat]

    slab_out = pl.pallas_call(
        _app_kernel,
        out_shape=jax.ShapeDtypeStruct((B, slab), jnp.float32),
        grid=grid,
        in_specs=in_specs,
        out_specs=pl.BlockSpec((TB, slab), lambda b: (b, 0)),
        compiler_params=pltpu.CompilerParams(
            dimension_semantics=("parallel",)),
    )(hidden_states, params["att_w"], params["att_b"],
      params["enc_fc_w"], params["enc_fc_b"], *flat)

    pers = slab_out[:, :pers_dim]
    mbti = slab_out[:, pers_dim:pers_dim + mbti_dim]
    logits = slab_out[:, pers_dim + mbti_dim:used]
    preds = {"mbti": mbti, "personality_embeddings": pers}
    for idx, name in enumerate(["cOPN", "cCON", "cEXT", "cAGR", "cNEU"]):
        preds[name] = logits[:, 2 * idx:2 * idx + 2]
    return preds


# ----------------------------------------------------------------------------
# Parameter init (deterministic, PyTorch-nn.Linear-style uniform)
# ----------------------------------------------------------------------------
def init_linear(key, fan_in, fan_out):
    kw, kb = jax.random.split(key)
    bound = 1.0 / float(fan_in) ** 0.5
    w = jax.random.uniform(kw, (fan_in, fan_out), jnp.float32, -bound, bound)
    b = jax.random.uniform(kb, (1, fan_out), jnp.float32, -bound, bound)
    return w, b


def init_app_params(key, config):
    emb = config["embedding_size"]
    hid = config["hidden_size"]
    pers = config["pers_embedding_size"]
    ocean = config["ocean_size"]
    keys = iter(jax.random.split(key, 32))

    params = {}
    # BERTEncoder head
    w_att, b_att = init_linear(next(keys), 768, 1)
    params["att_w"] = w_att.T                       # [1, 768]
    params["att_b"] = b_att                         # [1, 1]  (scalar, SMEM)
    params["enc_fc_w"], params["enc_fc_b"] = init_linear(next(keys), 768, emb)
    # fully_connected: 7 x (Linear + ReLU)
    dims = [emb] + [hid] * 7
    params["mlp"] = [init_linear(next(keys), dims[i], dims[i + 1]) for i in range(7)]
    # heads
    params["fc2"] = init_linear(next(keys), hid, pers)
    params["mbti"] = init_linear(next(keys), pers, 16)
    params["ocean"] = init_linear(next(keys), pers, ocean)
    # the 5 OCEAN classifiers are concatenated into one [ocean, 10] layer
    head_ws, head_bs = [], []
    for _ in range(5):                               # order: O, C, E, A, N
        w, b = init_linear(next(keys), ocean, 2)
        head_ws.append(w)
        head_bs.append(b)
    params["ocean_heads"] = (jnp.concatenate(head_ws, axis=1),
                             jnp.concatenate(head_bs, axis=1))
    return params


# ----------------------------------------------------------------------------
# Pure-JAX reference (for a light numerical check)
# ----------------------------------------------------------------------------
def app_forward_ref(params, hidden_states):
    src = hidden_states
    scores = jnp.einsum("bsd,od->bs", src, params["att_w"]) + params["att_b"][0, 0]
    wt = jax.nn.softmax(scores, axis=1)
    pooled = jnp.einsum("bs,bsd->bd", wt, src)
    h = pooled @ params["enc_fc_w"] + params["enc_fc_b"]
    for w, b in params["mlp"]:
        h = jax.nn.relu(h @ w + b)
    pers = jax.nn.relu(h) @ params["fc2"][0] + params["fc2"][1]
    pers_r = jax.nn.relu(pers)
    mbti = pers_r @ params["mbti"][0] + params["mbti"][1]
    ocean = jax.nn.relu(pers_r @ params["ocean"][0] + params["ocean"][1])
    logits = ocean @ params["ocean_heads"][0] + params["ocean_heads"][1]
    preds = {"mbti": mbti, "personality_embeddings": pers}
    for idx, name in enumerate(["cOPN", "cCON", "cEXT", "cAGR", "cNEU"]):
        preds[name] = logits[:, 2 * idx:2 * idx + 2]
    return preds


if __name__ == "__main__":
    config = {
        "embedding_size": 32,
        "hidden_size": 32,
        "pers_embedding_size": 16,
        "ocean_size": 8,
    }
    B, S, D = 2, 8, 768

    key = jax.random.PRNGKey(0)
    k_params, k_x = jax.random.split(key)
    params = init_app_params(k_params, config)
    # Stand-in for DistilBERT's last_hidden_state.
    hidden_states = jax.random.normal(k_x, (B, S, D), jnp.float32)

    preds = app_forward(params, hidden_states)
    preds = jax.block_until_ready(preds)

    # shape checks
    assert preds["mbti"].shape == (B, 16)
    assert preds["personality_embeddings"].shape == (B, config["pers_embedding_size"])
    for cat in ["cOPN", "cCON", "cEXT", "cAGR", "cNEU"]:
        assert preds[cat].shape == (B, 2)

    # light numerical check against a pure-JAX reference (approx reciprocal in
    # the kernel softmax -> loose tolerance)
    ref = app_forward_ref(params, hidden_states)
    for name in preds:
        assert jnp.allclose(preds[name], ref[name], rtol=1e-2, atol=1e-2), name

    print("KERNEL_OK")
</pallas_src>

<mosaic_0001>
module attributes {stable_mosaic.version = 11 : i64} {
  func.func @_app_kernel(%arg0: i32, %arg1: memref<2x8x768xf32, #tpu.memory_space<vmem>>, %arg2: memref<1x768xf32, #tpu.memory_space<vmem>>, %arg3: memref<1x1xf32, #tpu.memory_space<smem>>, %arg4: memref<768x32xf32, #tpu.memory_space<vmem>>, %arg5: memref<1x32xf32, #tpu.memory_space<vmem>>, %arg6: memref<32x32xf32, #tpu.memory_space<vmem>>, %arg7: memref<1x32xf32, #tpu.memory_space<vmem>>, %arg8: memref<32x32xf32, #tpu.memory_space<vmem>>, %arg9: memref<1x32xf32, #tpu.memory_space<vmem>>, %arg10: memref<32x32xf32, #tpu.memory_space<vmem>>, %arg11: memref<1x32xf32, #tpu.memory_space<vmem>>, %arg12: memref<32x32xf32, #tpu.memory_space<vmem>>, %arg13: memref<1x32xf32, #tpu.memory_space<vmem>>, %arg14: memref<32x32xf32, #tpu.memory_space<vmem>>, %arg15: memref<1x32xf32, #tpu.memory_space<vmem>>, %arg16: memref<32x32xf32, #tpu.memory_space<vmem>>, %arg17: memref<1x32xf32, #tpu.memory_space<vmem>>, %arg18: memref<32x32xf32, #tpu.memory_space<vmem>>, %arg19: memref<1x32xf32, #tpu.memory_space<vmem>>, %arg20: memref<32x16xf32, #tpu.memory_space<vmem>>, %arg21: memref<1x16xf32, #tpu.memory_space<vmem>>, %arg22: memref<16x16xf32, #tpu.memory_space<vmem>>, %arg23: memref<1x16xf32, #tpu.memory_space<vmem>>, %arg24: memref<16x8xf32, #tpu.memory_space<vmem>>, %arg25: memref<1x8xf32, #tpu.memory_space<vmem>>, %arg26: memref<8x10xf32, #tpu.memory_space<vmem>>, %arg27: memref<1x10xf32, #tpu.memory_space<vmem>>, %arg28: memref<2x128xf32, #tpu.memory_space<vmem>>) attributes {dimension_semantics = [#tpu.dimension_semantics<parallel>], iteration_bounds = array<i64: 1>, scalar_prefetch = 0 : i64, scratch_operands = 0 : i64, tpu.core_type = #tpu.core_type<tc>, window_params = [{transform_indices = @transform_0, window_bounds = array<i64: 2, 8, 768>}, {pipeline_mode = #tpu.pipeline_mode<synchronous>, transform_indices = @transform_1, window_bounds = array<i64: 1, 768>}, {transform_indices = @transform_2, window_bounds = array<i64: 1, 1>}, {pipeline_mode = #tpu.pipeline_mode<synchronous>, transform_indices = @transform_3, window_bounds = array<i64: 768, 32>}, {pipeline_mode = #tpu.pipeline_mode<synchronous>, transform_indices = @transform_4, window_bounds = array<i64: 1, 32>}, {pipeline_mode = #tpu.pipeline_mode<synchronous>, transform_indices = @transform_5, window_bounds = array<i64: 32, 32>}, {pipeline_mode = #tpu.pipeline_mode<synchronous>, transform_indices = @transform_6, window_bounds = array<i64: 1, 32>}, {pipeline_mode = #tpu.pipeline_mode<synchronous>, transform_indices = @transform_7, window_bounds = array<i64: 32, 32>}, {pipeline_mode = #tpu.pipeline_mode<synchronous>, transform_indices = @transform_8, window_bounds = array<i64: 1, 32>}, {pipeline_mode = #tpu.pipeline_mode<synchronous>, transform_indices = @transform_9, window_bounds = array<i64: 32, 32>}, {pipeline_mode = #tpu.pipeline_mode<synchronous>, transform_indices = @transform_10, window_bounds = array<i64: 1, 32>}, {pipeline_mode = #tpu.pipeline_mode<synchronous>, transform_indices = @transform_11, window_bounds = array<i64: 32, 32>}, {pipeline_mode = #tpu.pipeline_mode<synchronous>, transform_indices = @transform_12, window_bounds = array<i64: 1, 32>}, {pipeline_mode = #tpu.pipeline_mode<synchronous>, transform_indices = @transform_13, window_bounds = array<i64: 32, 32>}, {pipeline_mode = #tpu.pipeline_mode<synchronous>, transform_indices = @transform_14, window_bounds = array<i64: 1, 32>}, {pipeline_mode = #tpu.pipeline_mode<synchronous>, transform_indices = @transform_15, window_bounds = array<i64: 32, 32>}, {pipeline_mode = #tpu.pipeline_mode<synchronous>, transform_indices = @transform_16, window_bounds = array<i64: 1, 32>}, {pipeline_mode = #tpu.pipeline_mode<synchronous>, transform_indices = @transform_17, window_bounds = array<i64: 32, 32>}, {pipeline_mode = #tpu.pipeline_mode<synchronous>, transform_indices = @transform_18, window_bounds = array<i64: 1, 32>}, {pipeline_mode = #tpu.pipeline_mode<synchronous>, transform_indices = @transform_19, window_bounds = array<i64: 32, 16>}, {pipeline_mode = #tpu.pipeline_mode<synchronous>, transform_indices = @transform_20, window_bounds = array<i64: 1, 16>}, {pipeline_mode = #tpu.pipeline_mode<synchronous>, transform_indices = @transform_21, window_bounds = array<i64: 16, 16>}, {pipeline_mode = #tpu.pipeline_mode<synchronous>, transform_indices = @transform_22, window_bounds = array<i64: 1, 16>}, {pipeline_mode = #tpu.pipeline_mode<synchronous>, transform_indices = @transform_23, window_bounds = array<i64: 16, 8>}, {pipeline_mode = #tpu.pipeline_mode<synchronous>, transform_indices = @transform_24, window_bounds = array<i64: 1, 8>}, {pipeline_mode = #tpu.pipeline_mode<synchronous>, transform_indices = @transform_25, window_bounds = array<i64: 8, 10>}, {pipeline_mode = #tpu.pipeline_mode<synchronous>, transform_indices = @transform_26, window_bounds = array<i64: 1, 10>}, {transform_indices = @transform_27, window_bounds = array<i64: 2, 128>}]} {
    %c0 = arith.constant 0 : index
    %c0_0 = arith.constant 0 : index
    %c0_1 = arith.constant 0 : index
    %0 = vector.load %arg1[%c0, %c0_0, %c0_1] : memref<2x8x768xf32, #tpu.memory_space<vmem>>, vector<2x8x768xf32>
    %c0_2 = arith.constant 0 : index
    %c0_3 = arith.constant 0 : index
    %1 = vector.load %arg2[%c0_2, %c0_3] : memref<1x768xf32, #tpu.memory_space<vmem>>, vector<1x768xf32>
    %2 = vector.shape_cast %1 : vector<1x768xf32> to vector<1x1x768xf32>
    %3 = vector.broadcast %2 : vector<1x1x768xf32> to vector<2x8x768xf32>
    %4 = arith.mulf %0, %3 : vector<2x8x768xf32>
    %cst = arith.constant dense<0.000000e+00> : vector<2x8xf32>
    %5 = vector.multi_reduction <add>, %4, %cst [2] : vector<2x8x768xf32> to vector<2x8xf32>
    %c0_4 = arith.constant 0 : index
    %c0_5 = arith.constant 0 : index
    %6 = memref.load %arg3[%c0_4, %c0_5] : memref<1x1xf32, #tpu.memory_space<smem>>
    %7 = vector.broadcast %6 : f32 to vector<2x8xf32>
    %8 = arith.addf %5, %7 : vector<2x8xf32>
    %cst_6 = arith.constant dense<0xFF800000> : vector<2xf32>
    %9 = vector.multi_reduction <maximumf>, %8, %cst_6 [1] : vector<2x8xf32> to vector<2xf32>
    %10 = vector.shape_cast %9 : vector<2xf32> to vector<2x1xf32>
    %11 = vector.broadcast %10 : vector<2x1xf32> to vector<2x8xf32>
    %12 = arith.subf %8, %11 : vector<2x8xf32>
    %13 = math.exp %12 : vector<2x8xf32>
    %cst_7 = arith.constant dense<0.000000e+00> : vector<2xf32>
    %14 = vector.multi_reduction <add>, %13, %cst_7 [1] : vector<2x8xf32> to vector<2xf32>
    %15 = vector.shape_cast %14 : vector<2xf32> to vector<2x1xf32>
    %16 = tpu.reciprocal %15 {approx = true} : vector<2x1xf32> -> vector<2x1xf32>
    %17 = vector.broadcast %16 : vector<2x1xf32> to vector<2x8xf32>
    %18 = arith.mulf %13, %17 : vector<2x8xf32>
    %19 = vector.shape_cast %18 : vector<2x8xf32> to vector<2x1x8xf32>
    "tpu.trace_start"() <{level = 10 : i32, message = "bqs,bsd->bqd"}> : () -> ()
    %cst_8 = arith.constant dense<0.000000e+00> : vector<2x1x768xf32>
    %20 = tpu.matmul %19, %0, %cst_8 {dimension_numbers = #tpu.dot_dimension_numbers<[2], [1], [1], [2], [0, 0, 0, 1, 1, 2], [0], [0]>} : vector<2x1x8xf32>, vector<2x8x768xf32>, vector<2x1x768xf32> -> vector<2x1x768xf32>
    "tpu.trace_stop"() : () -> ()
    %21 = vector.shape_cast %20 : vector<2x1x768xf32> to vector<2x768xf32>
    %c0_9 = arith.constant 0 : index
    %c0_10 = arith.constant 0 : index
    %22 = vector.load %arg4[%c0_9, %c0_10] : memref<768x32xf32, #tpu.memory_space<vmem>>, vector<768x32xf32>
    %cst_11 = arith.constant dense<0.000000e+00> : vector<2x32xf32>
    %23 = tpu.matmul %21, %22, %cst_11 {dimension_numbers = #tpu.dot_dimension_numbers<[1], [0], [0], [1], [0, 0, 1, 1], [], []>} : vector<2x768xf32>, vector<768x32xf32>, vector<2x32xf32> -> vector<2x32xf32>
    %c0_12 = arith.constant 0 : index
    %c0_13 = arith.constant 0 : index
    %24 = vector.load %arg5[%c0_12, %c0_13] : memref<1x32xf32, #tpu.memory_space<vmem>>, vector<1x32xf32>
    %25 = vector.broadcast %24 : vector<1x32xf32> to vector<2x32xf32>
    %26 = arith.addf %23, %25 : vector<2x32xf32>
    %c0_14 = arith.constant 0 : index
    %c0_15 = arith.constant 0 : index
    %27 = vector.load %arg6[%c0_14, %c0_15] : memref<32x32xf32, #tpu.memory_space<vmem>>, vector<32x32xf32>
    %cst_16 = arith.constant dense<0.000000e+00> : vector<2x32xf32>
    %28 = tpu.matmul %26, %27, %cst_16 {dimension_numbers = #tpu.dot_dimension_numbers<[1], [0], [0], [1], [0, 0, 1, 1], [], []>} : vector<2x32xf32>, vector<32x32xf32>, vector<2x32xf32> -> vector<2x32xf32>
    %c0_17 = arith.constant 0 : index
    %c0_18 = arith.constant 0 : index
    %29 = vector.load %arg7[%c0_17, %c0_18] : memref<1x32xf32, #tpu.memory_space<vmem>>, vector<1x32xf32>
    %30 = vector.broadcast %29 : vector<1x32xf32> to vector<2x32xf32>
    %31 = arith.addf %28, %30 : vector<2x32xf32>
    %cst_19 = arith.constant 0.000000e+00 : f32
    %32 = vector.broadcast %cst_19 : f32 to vector<2x32xf32>
    %33 = arith.maximumf %31, %32 : vector<2x32xf32>
    %c0_20 = arith.constant 0 : index
    %c0_21 = arith.constant 0 : index
    %34 = vector.load %arg8[%c0_20, %c0_21] : memref<32x32xf32, #tpu.memory_space<vmem>>, vector<32x32xf32>
    %cst_22 = arith.constant dense<0.000000e+00> : vector<2x32xf32>
    %35 = tpu.matmul %33, %34, %cst_22 {dimension_numbers = #tpu.dot_dimension_numbers<[1], [0], [0], [1], [0, 0, 1, 1], [], []>} : vector<2x32xf32>, vector<32x32xf32>, vector<2x32xf32> -> vector<2x32xf32>
    %c0_23 = arith.constant 0 : index
    %c0_24 = arith.constant 0 : index
    %36 = vector.load %arg9[%c0_23, %c0_24] : memref<1x32xf32, #tpu.memory_space<vmem>>, vector<1x32xf32>
    %37 = vector.broadcast %36 : vector<1x32xf32> to vector<2x32xf32>
    %38 = arith.addf %35, %37 : vector<2x32xf32>
    %cst_25 = arith.constant 0.000000e+00 : f32
    %39 = vector.broadcast %cst_25 : f32 to vector<2x32xf32>
    %40 = arith.maximumf %38, %39 : vector<2x32xf32>
    %c0_26 = arith.constant 0 : index
    %c0_27 = arith.constant 0 : index
    %41 = vector.load %arg10[%c0_26, %c0_27] : memref<32x32xf32, #tpu.memory_space<vmem>>, vector<32x32xf32>
    %cst_28 = arith.constant dense<0.000000e+00> : vector<2x32xf32>
    %42 = tpu.matmul %40, %41, %cst_28 {dimension_numbers = #tpu.dot_dimension_numbers<[1], [0], [0], [1], [0, 0, 1, 1], [], []>} : vector<2x32xf32>, vector<32x32xf32>, vector<2x32xf32> -> vector<2x32xf32>
    %c0_29 = arith.constant 0 : index
    %c0_30 = arith.constant 0 : index
    %43 = vector.load %arg11[%c0_29, %c0_30] : memref<1x32xf32, #tpu.memory_space<vmem>>, vector<1x32xf32>
    %44 = vector.broadcast %43 : vector<1x32xf32> to vector<2x32xf32>
    %45 = arith.addf %42, %44 : vector<2x32xf32>
    %cst_31 = arith.constant 0.000000e+00 : f32
    %46 = vector.broadcast %cst_31 : f32 to vector<2x32xf32>
    %47 = arith.maximumf %45, %46 : vector<2x32xf32>
    %c0_32 = arith.constant 0 : index
    %c0_33 = arith.constant 0 : index
    %48 = vector.load %arg12[%c0_32, %c0_33] : memref<32x32xf32, #tpu.memory_space<vmem>>, vector<32x32xf32>
    %cst_34 = arith.constant dense<0.000000e+00> : vector<2x32xf32>
    %49 = tpu.matmul %47, %48, %cst_34 {dimension_numbers = #tpu.dot_dimension_numbers<[1], [0], [0], [1], [0, 0, 1, 1], [], []>} : vector<2x32xf32>, vector<32x32xf32>, vector<2x32xf32> -> vector<2x32xf32>
    %c0_35 = arith.constant 0 : index
    %c0_36 = arith.constant 0 : index
    %50 = vector.load %arg13[%c0_35, %c0_36] : memref<1x32xf32, #tpu.memory_space<vmem>>, vector<1x32xf32>
    %51 = vector.broadcast %50 : vector<1x32xf32> to vector<2x32xf32>
    %52 = arith.addf %49, %51 : vector<2x32xf32>
    %cst_37 = arith.constant 0.000000e+00 : f32
    %53 = vector.broadcast %cst_37 : f32 to vector<2x32xf32>
    %54 = arith.maximumf %52, %53 : vector<2x32xf32>
    %c0_38 = arith.constant 0 : index
    %c0_39 = arith.constant 0 : index
    %55 = vector.load %arg14[%c0_38, %c0_39] : memref<32x32xf32, #tpu.memory_space<vmem>>, vector<32x32xf32>
    %cst_40 = arith.constant dense<0.000000e+00> : vector<2x32xf32>
    %56 = tpu.matmul %54, %55, %cst_40 {dimension_numbers = #tpu.dot_dimension_numbers<[1], [0], [0], [1], [0, 0, 1, 1], [], []>} : vector<2x32xf32>, vector<32x32xf32>, vector<2x32xf32> -> vector<2x32xf32>
    %c0_41 = arith.constant 0 : index
    %c0_42 = arith.constant 0 : index
    %57 = vector.load %arg15[%c0_41, %c0_42] : memref<1x32xf32, #tpu.memory_space<vmem>>, vector<1x32xf32>
    %58 = vector.broadcast %57 : vector<1x32xf32> to vector<2x32xf32>
    %59 = arith.addf %56, %58 : vector<2x32xf32>
    %cst_43 = arith.constant 0.000000e+00 : f32
    %60 = vector.broadcast %cst_43 : f32 to vector<2x32xf32>
    %61 = arith.maximumf %59, %60 : vector<2x32xf32>
    %c0_44 = arith.constant 0 : index
    %c0_45 = arith.constant 0 : index
    %62 = vector.load %arg16[%c0_44, %c0_45] : memref<32x32xf32, #tpu.memory_space<vmem>>, vector<32x32xf32>
    %cst_46 = arith.constant dense<0.000000e+00> : vector<2x32xf32>
    %63 = tpu.matmul %61, %62, %cst_46 {dimension_numbers = #tpu.dot_dimension_numbers<[1], [0], [0], [1], [0, 0, 1, 1], [], []>} : vector<2x32xf32>, vector<32x32xf32>, vector<2x32xf32> -> vector<2x32xf32>
    %c0_47 = arith.constant 0 : index
    %c0_48 = arith.constant 0 : index
    %64 = vector.load %arg17[%c0_47, %c0_48] : memref<1x32xf32, #tpu.memory_space<vmem>>, vector<1x32xf32>
    %65 = vector.broadcast %64 : vector<1x32xf32> to vector<2x32xf32>
    %66 = arith.addf %63, %65 : vector<2x32xf32>
    %cst_49 = arith.constant 0.000000e+00 : f32
    %67 = vector.broadcast %cst_49 : f32 to vector<2x32xf32>
    %68 = arith.maximumf %66, %67 : vector<2x32xf32>
    %c0_50 = arith.constant 0 : index
    %c0_51 = arith.constant 0 : index
    %69 = vector.load %arg18[%c0_50, %c0_51] : memref<32x32xf32, #tpu.memory_space<vmem>>, vector<32x32xf32>
    %cst_52 = arith.constant dense<0.000000e+00> : vector<2x32xf32>
    %70 = tpu.matmul %68, %69, %cst_52 {dimension_numbers = #tpu.dot_dimension_numbers<[1], [0], [0], [1], [0, 0, 1, 1], [], []>} : vector<2x32xf32>, vector<32x32xf32>, vector<2x32xf32> -> vector<2x32xf32>
    %c0_53 = arith.constant 0 : index
    %c0_54 = arith.constant 0 : index
    %71 = vector.load %arg19[%c0_53, %c0_54] : memref<1x32xf32, #tpu.memory_space<vmem>>, vector<1x32xf32>
    %72 = vector.broadcast %71 : vector<1x32xf32> to vector<2x32xf32>
    %73 = arith.addf %70, %72 : vector<2x32xf32>
    %cst_55 = arith.constant 0.000000e+00 : f32
    %74 = vector.broadcast %cst_55 : f32 to vector<2x32xf32>
    %75 = arith.maximumf %73, %74 : vector<2x32xf32>
    %c0_56 = arith.constant 0 : index
    %c0_57 = arith.constant 0 : index
    %76 = vector.load %arg20[%c0_56, %c0_57] : memref<32x16xf32, #tpu.memory_space<vmem>>, vector<32x16xf32>
    %cst_58 = arith.constant dense<0.000000e+00> : vector<2x16xf32>
    %77 = tpu.matmul %75, %76, %cst_58 {dimension_numbers = #tpu.dot_dimension_numbers<[1], [0], [0], [1], [0, 0, 1, 1], [], []>} : vector<2x32xf32>, vector<32x16xf32>, vector<2x16xf32> -> vector<2x16xf32>
    %c0_59 = arith.constant 0 : index
    %c0_60 = arith.constant 0 : index
    %78 = vector.load %arg21[%c0_59, %c0_60] : memref<1x16xf32, #tpu.memory_space<vmem>>, vector<1x16xf32>
    %79 = vector.broadcast %78 : vector<1x16xf32> to vector<2x16xf32>
    %80 = arith.addf %77, %79 : vector<2x16xf32>
    %cst_61 = arith.constant 0.000000e+00 : f32
    %81 = vector.broadcast %cst_61 : f32 to vector<2x16xf32>
    %82 = arith.maximumf %80, %81 : vector<2x16xf32>
    %c0_62 = arith.constant 0 : index
    %c0_63 = arith.constant 0 : index
    %83 = vector.load %arg22[%c0_62, %c0_63] : memref<16x16xf32, #tpu.memory_space<vmem>>, vector<16x16xf32>
    %cst_64 = arith.constant dense<0.000000e+00> : vector<2x16xf32>
    %84 = tpu.matmul %82, %83, %cst_64 {dimension_numbers = #tpu.dot_dimension_numbers<[1], [0], [0], [1], [0, 0, 1, 1], [], []>} : vector<2x16xf32>, vector<16x16xf32>, vector<2x16xf32> -> vector<2x16xf32>
    %c0_65 = arith.constant 0 : index
    %c0_66 = arith.constant 0 : index
    %85 = vector.load %arg23[%c0_65, %c0_66] : memref<1x16xf32, #tpu.memory_space<vmem>>, vector<1x16xf32>
    %86 = vector.broadcast %85 : vector<1x16xf32> to vector<2x16xf32>
    %87 = arith.addf %84, %86 : vector<2x16xf32>
    %c0_67 = arith.constant 0 : index
    %c0_68 = arith.constant 0 : index
    %88 = vector.load %arg24[%c0_67, %c0_68] : memref<16x8xf32, #tpu.memory_space<vmem>>, vector<16x8xf32>
    %cst_69 = arith.constant dense<0.000000e+00> : vector<2x8xf32>
    %89 = tpu.matmul %82, %88, %cst_69 {dimension_numbers = #tpu.dot_dimension_numbers<[1], [0], [0], [1], [0, 0, 1, 1], [], []>} : vector<2x16xf32>, vector<16x8xf32>, vector<2x8xf32> -> vector<2x8xf32>
    %c0_70 = arith.constant 0 : index
    %c0_71 = arith.constant 0 : index
    %90 = vector.load %arg25[%c0_70, %c0_71] : memref<1x8xf32, #tpu.memory_space<vmem>>, vector<1x8xf32>
    %91 = vector.broadcast %90 : vector<1x8xf32> to vector<2x8xf32>
    %92 = arith.addf %89, %91 : vector<2x8xf32>
    %cst_72 = arith.constant 0.000000e+00 : f32
    %93 = vector.broadcast %cst_72 : f32 to vector<2x8xf32>
    %94 = arith.maximumf %92, %93 : vector<2x8xf32>
    %c0_73 = arith.constant 0 : index
    %c0_74 = arith.constant 0 : index
    %95 = vector.load %arg26[%c0_73, %c0_74] : memref<8x10xf32, #tpu.memory_space<vmem>>, vector<8x10xf32>
    %cst_75 = arith.constant dense<0.000000e+00> : vector<2x10xf32>
    %96 = tpu.matmul %94, %95, %cst_75 {dimension_numbers = #tpu.dot_dimension_numbers<[1], [0], [0], [1], [0, 0, 1, 1], [], []>} : vector<2x8xf32>, vector<8x10xf32>, vector<2x10xf32> -> vector<2x10xf32>
    %c0_76 = arith.constant 0 : index
    %c0_77 = arith.constant 0 : index
    %97 = vector.load %arg27[%c0_76, %c0_77] : memref<1x10xf32, #tpu.memory_space<vmem>>, vector<1x10xf32>
    %98 = vector.broadcast %97 : vector<1x10xf32> to vector<2x10xf32>
    %99 = arith.addf %96, %98 : vector<2x10xf32>
    %cst_78 = arith.constant 0.000000e+00 : f32
    %100 = vector.broadcast %cst_78 : f32 to vector<2x86xf32>
    %101 = tpu.concatenate %80, %87, %99, %100 in 1 : vector<2x16xf32>, vector<2x16xf32>, vector<2x10xf32>, vector<2x86xf32> -> vector<2x128xf32>
    %c0_79 = arith.constant 0 : index
    %c0_80 = arith.constant 0 : index
    %102 = vector.load %arg28[%c0_79, %c0_80] : memref<2x128xf32, #tpu.memory_space<vmem>>, vector<2x128xf32>
    tpu.vector_store %arg28[%c0_79, %c0_80], %101 {strides = array<i32>} : memref<2x128xf32, #tpu.memory_space<vmem>>, vector<2x128xf32>,
    return
  }
  func.func @transform_0(%arg0: i32) -> (i32, i32, i32) {
    %c0_i32 = arith.constant 0 : i32
    %c0_i32_0 = arith.constant 0 : i32
    %c0_i32_1 = arith.constant 0 : i32
    return %arg0, %c0_i32, %c0_i32_0 : i32, i32, i32
  }
  func.func @transform_1(%arg0: i32) -> (i32, i32) {
    %c0_i32 = arith.constant 0 : i32
    %c0_i32_0 = arith.constant 0 : i32
    %c0_i32_1 = arith.constant 0 : i32
    return %c0_i32, %c0_i32_0 : i32, i32
  }
  func.func @transform_2(%arg0: i32) -> (i32, i32) {
    %c0_i32 = arith.constant 0 : i32
    %c0_i32_0 = arith.constant 0 : i32
    %c0_i32_1 = arith.constant 0 : i32
    return %c0_i32, %c0_i32_0 : i32, i32
  }
  func.func @transform_3(%arg0: i32) -> (i32, i32) {
    %c0_i32 = arith.constant 0 : i32
    %c0_i32_0 = arith.constant 0 : i32
    %c0_i32_1 = arith.constant 0 : i32
    return %c0_i32, %c0_i32_0 : i32, i32
  }
  func.func @transform_4(%arg0: i32) -> (i32, i32) {
    %c0_i32 = arith.constant 0 : i32
    %c0_i32_0 = arith.constant 0 : i32
    %c0_i32_1 = arith.constant 0 : i32
    return %c0_i32, %c0_i32_0 : i32, i32
  }
  func.func @transform_5(%arg0: i32) -> (i32, i32) {
    %c0_i32 = arith.constant 0 : i32
    %c0_i32_0 = arith.constant 0 : i32
    %c0_i32_1 = arith.constant 0 : i32
    return %c0_i32, %c0_i32_0 : i32, i32
  }
  func.func @transform_6(%arg0: i32) -> (i32, i32) {
    %c0_i32 = arith.constant 0 : i32
    %c0_i32_0 = arith.constant 0 : i32
    %c0_i32_1 = arith.constant 0 : i32
    return %c0_i32, %c0_i32_0 : i32, i32
  }
  func.func @transform_7(%arg0: i32) -> (i32, i32) {
    %c0_i32 = arith.constant 0 : i32
    %c0_i32_0 = arith.constant 0 : i32
    %c0_i32_1 = arith.constant 0 : i32
    return %c0_i32, %c0_i32_0 : i32, i32
  }
  func.func @transform_8(%arg0: i32) -> (i32, i32) {
    %c0_i32 = arith.constant 0 : i32
    %c0_i32_0 = arith.constant 0 : i32
    %c0_i32_1 = arith.constant 0 : i32
    return %c0_i32, %c0_i32_0 : i32, i32
  }
  func.func @transform_9(%arg0: i32) -> (i32, i32) {
    %c0_i32 = arith.constant 0 : i32
    %c0_i32_0 = arith.constant 0 : i32
    %c0_i32_1 = arith.constant 0 : i32
    return %c0_i32, %c0_i32_0 : i32, i32
  }
  func.func @transform_10(%arg0: i32) -> (i32, i32) {
    %c0_i32 = arith.constant 0 : i32
    %c0_i32_0 = arith.constant 0 : i32
    %c0_i32_1 = arith.constant 0 : i32
    return %c0_i32, %c0_i32_0 : i32, i32
  }
  func.func @transform_11(%arg0: i32) -> (i32, i32) {
    %c0_i32 = arith.constant 0 : i32
    %c0_i32_0 = arith.constant 0 : i32
    %c0_i32_1 = arith.constant 0 : i32
    return %c0_i32, %c0_i32_0 : i32, i32
  }
  func.func @transform_12(%arg0: i32) -> (i32, i32) {
    %c0_i32 = arith.constant 0 : i32
    %c0_i32_0 = arith.constant 0 : i32
    %c0_i32_1 = arith.constant 0 : i32
    return %c0_i32, %c0_i32_0 : i32, i32
  }
  func.func @transform_13(%arg0: i32) -> (i32, i32) {
    %c0_i32 = arith.constant 0 : i32
    %c0_i32_0 = arith.constant 0 : i32
    %c0_i32_1 = arith.constant 0 : i32
    return %c0_i32, %c0_i32_0 : i32, i32
  }
  func.func @transform_14(%arg0: i32) -> (i32, i32) {
    %c0_i32 = arith.constant 0 : i32
    %c0_i32_0 = arith.constant 0 : i32
    %c0_i32_1 = arith.constant 0 : i32
    return %c0_i32, %c0_i32_0 : i32, i32
  }
  func.func @transform_15(%arg0: i32) -> (i32, i32) {
    %c0_i32 = arith.constant 0 : i32
    %c0_i32_0 = arith.constant 0 : i32
    %c0_i32_1 = arith.constant 0 : i32
    return %c0_i32, %c0_i32_0 : i32, i32
  }
  func.func @transform_16(%arg0: i32) -> (i32, i32) {
    %c0_i32 = arith.constant 0 : i32
    %c0_i32_0 = arith.constant 0 : i32
    %c0_i32_1 = arith.constant 0 : i32
    return %c0_i32, %c0_i32_0 : i32, i32
  }
  func.func @transform_17(%arg0: i32) -> (i32, i32) {
    %c0_i32 = arith.constant 0 : i32
    %c0_i32_0 = arith.constant 0 : i32
    %c0_i32_1 = arith.constant 0 : i32
    return %c0_i32, %c0_i32_0 : i32, i32
  }
  func.func @transform_18(%arg0: i32) -> (i32, i32) {
    %c0_i32 = arith.constant 0 : i32
    %c0_i32_0 = arith.constant 0 : i32
    %c0_i32_1 = arith.constant 0 : i32
    return %c0_i32, %c0_i32_0 : i32, i32
  }
  func.func @transform_19(%arg0: i32) -> (i32, i32) {
    %c0_i32 = arith.constant 0 : i32
    %c0_i32_0 = arith.constant 0 : i32
    %c0_i32_1 = arith.constant 0 : i32
    return %c0_i32, %c0_i32_0 : i32, i32
  }
  func.func @transform_20(%arg0: i32) -> (i32, i32) {
    %c0_i32 = arith.constant 0 : i32
    %c0_i32_0 = arith.constant 0 : i32
    %c0_i32_1 = arith.constant 0 : i32
    return %c0_i32, %c0_i32_0 : i32, i32
  }
  func.func @transform_21(%arg0: i32) -> (i32, i32) {
    %c0_i32 = arith.constant 0 : i32
    %c0_i32_0 = arith.constant 0 : i32
    %c0_i32_1 = arith.constant 0 : i32
    return %c0_i32, %c0_i32_0 : i32, i32
  }
  func.func @transform_22(%arg0: i32) -> (i32, i32) {
    %c0_i32 = arith.constant 0 : i32
    %c0_i32_0 = arith.constant 0 : i32
    %c0_i32_1 = arith.constant 0 : i32
    return %c0_i32, %c0_i32_0 : i32, i32
  }
  func.func @transform_23(%arg0: i32) -> (i32, i32) {
    %c0_i32 = arith.constant 0 : i32
    %c0_i32_0 = arith.constant 0 : i32
    %c0_i32_1 = arith.constant 0 : i32
    return %c0_i32, %c0_i32_0 : i32, i32
  }
  func.func @transform_24(%arg0: i32) -> (i32, i32) {
    %c0_i32 = arith.constant 0 : i32
    %c0_i32_0 = arith.constant 0 : i32
    %c0_i32_1 = arith.constant 0 : i32
    return %c0_i32, %c0_i32_0 : i32, i32
  }
  func.func @transform_25(%arg0: i32) -> (i32, i32) {
    %c0_i32 = arith.constant 0 : i32
    %c0_i32_0 = arith.constant 0 : i32
    %c0_i32_1 = arith.constant 0 : i32
    return %c0_i32, %c0_i32_0 : i32, i32
  }
  func.func @transform_26(%arg0: i32) -> (i32, i32) {
    %c0_i32 = arith.constant 0 : i32
    %c0_i32_0 = arith.constant 0 : i32
    %c0_i32_1 = arith.constant 0 : i32
    return %c0_i32, %c0_i32_0 : i32, i32
  }
  func.func @transform_27(%arg0: i32) -> (i32, i32) {
    %c0_i32 = arith.constant 0 : i32
    %c0_i32_0 = arith.constant 0 : i32
    return %arg0, %c0_i32 : i32, i32
  }
}

</mosaic_0001>

<bundles_post_ra>
// kernel: tpu_custom_call.1
= control target key start
LH: loop header
LB: loop body
LE: loop exit
PB: predicated region body
PF: predicated region fallthrough
CT: control target
= control target key end

     0   :  { %s1816_s0 = inlined_call_operand.vmem [shape: f32[2,8,768], index: 0, kind: input, shape index: {}]   ;;  %s1817_s1 = inlined_call_operand.vmem [shape: f32[1,768], index: 1, kind: input, shape index: {}]   ;;  %s1818_s2 = inlined_call_operand.<no memory space> [shape: f32[1,1], index: 2, kind: input, shape index: {}]   ;;  %s1819_s3 = inlined_call_operand.vmem [shape: f32[768,32], index: 3, kind: input, shape index: {}]   ;;  %s1820_s4 = inlined_call_operand.vmem [shape: f32[1,32], index: 4, kind: input, shape index: {}]   ;;  %s1821_s5 = inlined_call_operand.vmem [shape: f32[32,32], index: 5, kind: input, shape index: {}]   ;;  %s1822_s6 = inlined_call_operand.vmem [shape: f32[1,32], index: 6, kind: input, shape index: {}]   ;;  %s1823_s7 = inlined_call_operand.vmem [shape: f32[32,32], index: 7, kind: input, shape index: {}]   ;;  %s1824_s8 = inlined_call_operand.vmem [shape: f32[1,32], index: 8, kind: input, shape index: {}]   ;;  %s1825_s9 = inlined_call_operand.vmem [shape: f32[32,32], index: 9, kind: input, shape index: {}]   ;;  %s1826_s10 = inlined_call_operand.vmem [shape: f32[1,32], index: 10, kind: input, shape index: {}]   ;;  %s1827_s11 = inlined_call_operand.vmem [shape: f32[32,32], index: 11, kind: input, shape index: {}]   ;;  %s1828_s12 = inlined_call_operand.vmem [shape: f32[1,32], index: 12, kind: input, shape index: {}]   ;;  %s1829_s13 = inlined_call_operand.vmem [shape: f32[32,32], index: 13, kind: input, shape index: {}]   ;;  %s1830_s14 = inlined_call_operand.vmem [shape: f32[1,32], index: 14, kind: input, shape index: {}]   ;;  %s1831_s15 = inlined_call_operand.vmem [shape: f32[32,32], index: 15, kind: input, shape index: {}]   ;;  %s1832_s16 = inlined_call_operand.vmem [shape: f32[1,32], index: 16, kind: input, shape index: {}]   ;;  %s1833_s17 = inlined_call_operand.vmem [shape: f32[32,32], index: 17, kind: input, shape index: {}]   ;;  %s1834_s18 = inlined_call_operand.vmem [shape: f32[1,32], index: 18, kind: input, shape index: {}]   ;;  %s1835_s19 = inlined_call_operand.vmem [shape: f32[32,16], index: 19, kind: input, shape index: {}]   ;;  %s1836_s20 = inlined_call_operand.vmem [shape: f32[1,16], index: 20, kind: input, shape index: {}]   ;;  %s1837_s21 = inlined_call_operand.vmem [shape: f32[16,16], index: 21, kind: input, shape index: {}]   ;;  %s1838_s22 = inlined_call_operand.vmem [shape: f32[1,16], index: 22, kind: input, shape index: {}]   ;;  %s1839_s23 = inlined_call_operand.vmem [shape: f32[16,8], index: 23, kind: input, shape index: {}]   ;;  %s1840_s24 = inlined_call_operand.vmem [shape: f32[1,8], index: 24, kind: input, shape index: {}]   ;;  %s1841_s25 = inlined_call_operand.vmem [shape: f32[8,10], index: 25, kind: input, shape index: {}]   ;;  %s1842_s26 = inlined_call_operand.vmem [shape: f32[1,10], index: 26, kind: input, shape index: {}]   ;;  %s1843_s27 = inlined_call_operand.hbm [shape: f32[2,128], index: 27, kind: output, shape index: {}]  }
   0x1   :  { %1850 = sst [smem:[#allocation6_spill]] %s1816_s0 }
   0x2   :  { %1851 = sst [smem:[#allocation7_spill]] %s1817_s1 }
   0x3   :  { %1852 = sst [smem:[#allocation8_spill]] %s1818_s2 }
   0x4   :  { %1853 = sst [smem:[#allocation9_spill]] %s1819_s3 }
   0x5   :  { %1854 = sst [smem:[#allocation10_spill]] %s1820_s4 }
   0x6   :  { %1855 = sst [smem:[#allocation11_spill]] %s1821_s5 }
   0x7   :  { %1856 = sst [smem:[#allocation12_spill]] %s1822_s6 }
   0x8   :  { %1857 = sst [smem:[#allocation13_spill]] %s1823_s7 }
   0x9   :  { %1858 = sst [smem:[#allocation14_spill]] %s1824_s8 }
   0xa   :  { %1859 = sst [smem:[#allocation15_spill]] %s1825_s9 }
   0xb   :  { %1860 = sst [smem:[#allocation16_spill]] %s1826_s10 }
   0xc   :  { %1861 = sst [smem:[#allocation17_spill]] %s1827_s11 }
   0xd   :  { %s1862_s8 = sld [smem:[#allocation6_spill]] }
   0xe   :  { %s1863_s7 = sld [smem:[#allocation7_spill]] }
  0x13   :  { %v88_v0 = vld [vmem:[%s1862_s8] sm:$0xff]  ;;  %v89_v1 = vld [vmem:[%s1862_s8 + $0x8] sm:$0xff]  ;;  %v90_v2 = vld [vmem:[%s1862_s8 + $0x10] sm:$0xff] }
  0x14   :  { %v91_v3 = vld [vmem:[%s1862_s8 + $0x18] sm:$0xff]  ;;  %214 = vmatpush.msra.mxu0 %v88_v0  ;;  %234 = vmatpush.msra.mxu1 %v89_v1  ;;  %v92_v4 = vld [vmem:[%s1862_s8 + $0x20] sm:$0xff]  ;;  %v93_v5 = vld [vmem:[%s1862_s8 + $0x28] sm:$0xff] }
  0x15   :  { %v100_v6 = vld [vmem:[%s1863_s7] sm:$0x3f]  ;;  %254 = vmatpush.msra.mxu2 %v90_v2  ;;  %274 = vmatpush.msra.mxu3 %v91_v3  ;;  %v94_v11 = vld [vmem:[%s1862_s8 + $0x30] sm:$0xff]  ;;  %v95_v12 = vld [vmem:[%s1862_s8 + $0x38] sm:$0xff] }
  0x16   :  { %v102_v7 = vperm.slane %v100_v6, 0  ;;  %v103_v8 = vperm.slane %v100_v6, 1  ;;  %v104_v9 = vperm.slane %v100_v6, 2  ;;  %v105_v10 = vperm.slane %v100_v6, 3  ;;  %294 = vmatpush.msrb.mxu0 %v92_v4  ;;  %314 = vmatpush.msrb.mxu1 %v93_v5  ;;  %v1315_v15 = vld [vmem:[%s1862_s8 + $0x40] sm:$0xff]  ;;  %v1320_v16 = vld [vmem:[%s1862_s8 + $0x48] sm:$0xff] }
  0x17   :  { %v106_v13 = vperm.slane %v100_v6, 4  ;;  %v107_v14 = vperm.slane %v100_v6, 5  ;;  %341 = vmatpush.msrb.mxu2 %v94_v11  ;;  %361 = vmatpush.msrb.mxu3 %v95_v12 }
  0x18   :  { %v114_v17 = vmul.f32 %v102_v7, %v88_v0  ;;  %v115_v18 = vmul.f32 %v103_v8, %v89_v1  ;;  %v116_v19 = vmul.f32 %v104_v9, %v90_v2  ;;  %v120_v20 = vmul.f32 %v102_v7, %v94_v11 }
  0x19   :  { %v121_v21 = vmul.f32 %v103_v8, %v95_v12  ;;  %v117_v22 = vmul.f32 %v105_v10, %v91_v3  ;;  %v122_v24 = vmul.f32 %v104_v9, %v1315_v15 }
  0x1a   :  { %v126_v23 = vadd.f32 %v115_v18, %v114_v17 }
  0x1b   :  { %v133_v25 = vadd.f32 %v121_v21, %v120_v20 }
  0x1c   :  { %33 = vsyncpa [#allocation4], 0  ;;  %v118_v26 = vmul.f32 %v106_v13, %v92_v4  ;;  %v127_v27 = vadd.f32 %v126_v23, %v116_v19  ;;  %v123_v28 = vmul.f32 %v105_v10, %v1320_v16  ;;  %v1327_v29 = vld [vmem:[%s1862_s8 + $0x50] sm:$0xff]  ;;  %v119_v31 = vmul.f32 %v107_v14, %v93_v5  ;;  %v1333_v36 = vld [vmem:[%s1862_s8 + $0x58] sm:$0xff]  ;;  %s1864_s4 = sld [smem:[#allocation8_spill]] }
  0x1d   :  { %v134_v30 = vadd.f32 %v133_v25, %v122_v24  ;;  %v124_v34 = vmul.f32 %v106_v13, %v1327_v29  ;;  %v125_v38 = vmul.f32 %v107_v14, %v1333_v36  ;;  %v146_v42 = vlaneseq  ;;  %s1865_s9 = sld [smem:[#allocation9_spill]] }
  0x1e   :  { %v128_v32 = vadd.f32 %v127_v27, %v117_v22  ;;  %vm150_vm0 = vcmask 1041409   ;;  %vm153_vm1 = vcmask 58368   ;;  %v1141_v52 = vmov 0   ;;  %s1866_s3 = sld [smem:[#allocation11_spill]] }
  0x1f   :  { %v135_v35 = vadd.f32 %v134_v30, %v123_v28  ;;  %v147_v44 = vand.u32 127, %v146_v42  ;;  %1095 = vset.pattern.permute.xlu2 %v1141_v52  ;;  %1094 = vset.pattern.permute.xlu1 %v1141_v52  ;;  %vm196_vm2 = vcmask 64512   ;;  %s1867_s29 = sld [smem:[#allocation13_spill]]  ;;  %vm704_vm3 = vcmask 261120  }
  0x20   :  { %v129_v33 = vadd.f32 %v128_v32, %v118_v26  ;;  %1096 = vset.pattern.permute.xlu0 %v1141_v52  ;;  %s1868_s2 = sld [smem:[#allocation10_spill]]  ;;  %vm959_vm4 = vcmask 130048   ;;  %vm1048_vm5 = vcmask 343040  }
  0x21   :  { %v136_v39 = vadd.f32 %v135_v35, %v124_v34  ;;  %s1869_s28 = sld [smem:[#allocation15_spill]] }
  0x22   :  { %v130_v37 = vadd.f32 %v129_v33, %v119_v31  ;;  %v141_v43 = vstv %s1864_s4  ;;  %s1870_s11 = sld [smem:[#allocation12_spill]] }
  0x23   :  { %v137_v40 = vadd.f32 %v136_v39, %v125_v38  ;;  %v461_v14 = vld [vmem:[%s1865_s9 + $0x78] sm:$0xff]  ;;  %v460_v18 = vld [vmem:[%s1865_s9 + $0x70] sm:$0xff]  ;;  %v459_v22 = vld [vmem:[%s1865_s9 + $0x68] sm:$0xff]  ;;  %s1871_s8 = sld [smem:[#allocation17_spill]] }
  0x24   :  { %131 = vadd.xlane.f32.xlu0 %v130_v37  ;;  %v477_v17 = vld [vmem:[%s1865_s9 + $0xf8] sm:$0xff]  ;;  %v476_v19 = vld [vmem:[%s1865_s9 + $0xf0] sm:$0xff]  ;;  %v475_v23 = vld [vmem:[%s1865_s9 + $0xe8] sm:$0xff]  ;;  %s1872_s1 = sld [smem:[#allocation14_spill]] }
  0x25   :  { %v492_v20 = vld [vmem:[%s1865_s9 + $0x170] sm:$0xff]  ;;  %v491_v24 = vld [vmem:[%s1865_s9 + $0x168] sm:$0xff]  ;;  %v458_v26 = vld [vmem:[%s1865_s9 + $0x60] sm:$0xff]  ;;  %s1873_s5 = sld [smem:[#allocation16_spill]] }
  0x26   :  { %v508_v21 = vld [vmem:[%s1865_s9 + $0x1f0] sm:$0xff]  ;;  %v507_v25 = vld [vmem:[%s1865_s9 + $0x1e8] sm:$0xff]  ;;  %v474_v27 = vld [vmem:[%s1865_s9 + $0xe0] sm:$0xff] }
  0x27   :  { %v490_v28 = vld [vmem:[%s1865_s9 + $0x160] sm:$0xff]  ;;  %v457_v30 = vld [vmem:[%s1865_s9 + $0x58] sm:$0xff]  ;;  %v456_v34 = vld [vmem:[%s1865_s9 + $0x50] sm:$0xff] }
  0x28   :  { %v473_v31 = vld [vmem:[%s1865_s9 + $0xd8] sm:$0xff]  ;;  %v472_v35 = vld [vmem:[%s1865_s9 + $0xd0] sm:$0xff]  ;;  %v455_v38 = vld [vmem:[%s1865_s9 + $0x48] sm:$0xff] }
  0x29   :  { %v489_v32 = vld [vmem:[%s1865_s9 + $0x158] sm:$0xff]  ;;  %v504_v37 = vld [vmem:[%s1865_s9 + $0x1d0] sm:$0xff]  ;;  %v471_v39 = vld [vmem:[%s1865_s9 + $0xc8] sm:$0xff] }
  0x2a   :  { %v505_v33 = vld [vmem:[%s1865_s9 + $0x1d8] sm:$0xff]  ;;  %v448_v52 = vld [vmem:[%s1865_s9 + $0x10] sm:$0xff] }
  0x2b   :  { %v453_v42 = vld [vmem:[%s1865_s9 + $0x38] sm:$0xff] }
  0x2c   :  { %138 = vadd.xlane.f32.xlu0 %v137_v40  ;;  %v454_v40 = vld [vmem:[%s1865_s9 + $0x40] sm:$0xff] }
  0x97   :  { %v132_v41 = vpop.xlane.xlu0 %131 }
  0x98   :  { %v142_v45 = vadd.f32 %v141_v43, %v132_v41  ;;  %v470_v41 = vld [vmem:[%s1865_s9 + $0xc0] sm:$0xff] }
  0x9a   :  { %v148_v48 = vperm.slane %v142_v45, %v147_v44 }
  0x9f   :  { %v139_v46 = vpop.xlane.xlu0 %138 }
  0xa0   :  { %v143_v47 = vadd.f32 %v141_v43, %v139_v46  ;;  %v469_v43 = vld [vmem:[%s1865_s9 + $0xb8] sm:$0xff]  ;;  %v451_v46 = vld [vmem:[%s1865_s9 + $0x28] sm:$0xff] }
  0xa2   :  { %v149_v49 = vperm.slane %v143_v47, %v147_v44 }
  0xa4   :  { %v151_v50 = vsel %vm150_vm0, %v149_v49, %v148_v48  ;;  %v450_v48 = vld [vmem:[%s1865_s9 + $0x20] sm:$0xff] }
  0xa5   :  { %v154_v51 = vsel %vm153_vm1, %v151_v50, -inf  ;;  %v466_v49 = vld [vmem:[%s1865_s9 + $0xa0] sm:$0xff]  ;;  %v449_v50 = vld [vmem:[%s1865_s9 + $0x18] sm:$0xff] }
  0xa6   :  { %155 = vmax.xlane.f32.xlu1 %v154_v51  ;;  %v465_v51 = vld [vmem:[%s1865_s9 + $0x98] sm:$0xff] }
 0x119   :  { %v156_v53 = vpop.xlane.xlu1 %155 }
 0x11a   :  { %v158_v54 = vperm.slane %v156_v53, 0  ;;  %v159_v55 = vperm.slane %v156_v53, 1  ;;  %v464_v53 = vld [vmem:[%s1865_s9 + $0x90] sm:$0xff] }
 0x11c   :  { %v162_v56 = vsub.f32 %v142_v45, %v158_v54  ;;  %v163_v57 = vsub.f32 %v143_v47, %v159_v55  ;;  %v468_v45 = vld [vmem:[%s1865_s9 + $0xb0] sm:$0xff]  ;;  %v467_v47 = vld [vmem:[%s1865_s9 + $0xa8] sm:$0xff] }
 0x11d   :  { %v447_v54 = vld [vmem:[%s1865_s9 + $0x8] sm:$0xff] }
 0x11e   :  { %v164_v58 = vmul.f32 1.442695, %v162_v56  ;;  %v166_v59 = vmul.f32 1.442695, %v163_v57  ;;  %v463_v55 = vld [vmem:[%s1865_s9 + $0x88] sm:$0xff]  ;;  %v446_v56 = vld [vmem:[%s1865_s9] sm:$0xff] }
 0x11f   :  { %v462_v57 = vld [vmem:[%s1865_s9 + $0x80] sm:$0xff] }
 0x120   :  { %1109 = vpow2.f32 %v164_v58  ;;  %v525_v58 = vld [vmem:[%s1865_s9 + $0x278] sm:$0xff] }
 0x121   :  { %1111 = vpow2.f32 %v166_v59  ;;  %v541_v59 = vld [vmem:[%s1865_s9 + $0x2f8] sm:$0xff] }
 0x126   :  { %v1110_v60 = vpop.eup %1109 }
 0x127   :  { %v1112_v61 = vpop.eup %1111  ;;  %171 = vperm.xlu1 %1094, %v1110_v60  }
 0x128   :  { %174 = vperm.xlu2 %1095, %v1112_v61  }
 0x182   :  { %v175_v62 = vpop.permute.xlu2 %174 }
 0x183   :  { %v177_v0 = vperm.slane %v175_v62, %v147_v44  ;;  %v523_v62 = vld [vmem:[%s1865_s9 + $0x268] sm:$0xff] }
 0x199   :  { %v172_v63 = vpop.permute.xlu1 %171 }
 0x19a   :  { %v176_v1 = vperm.slane %v172_v63, %v147_v44  ;;  %v539_v63 = vld [vmem:[%s1865_s9 + $0x2e8] sm:$0xff] }
 0x19c   :  { %v178_v2 = vsel %vm150_vm0, %v177_v0, %v176_v1  ;;  %v487_v0 = vld [vmem:[%s1865_s9 + $0x148] sm:$0xff] }
 0x19d   :  { %v180_v3 = vsel %vm153_vm1, %v178_v2, 0.0  ;;  %v503_v1 = vld [vmem:[%s1865_s9 + $0x1c8] sm:$0xff]  ;;  %v522_v2 = vld [vmem:[%s1865_s9 + $0x260] sm:$0xff] }
 0x19e   :  { %181 = vadd.xlane.f32.xlu2 %v180_v3  ;;  %v538_v3 = vld [vmem:[%s1865_s9 + $0x2e0] sm:$0xff] }
 0x211   :  { %v182_v4 = vpop.xlane.xlu2 %181 }
 0x212   :  { %1113 = vrcp.f32 %v182_v4  ;;  %v486_v4 = vld [vmem:[%s1865_s9 + $0x140] sm:$0xff] }
 0x218   :  { %v1114_v5 = vpop.eup %1113 }
 0x219   :  { %v186_v6 = vperm.slane %v1114_v5, 1  ;;  %v185_v7 = vperm.slane %v1114_v5, 0  ;;  %v502_v5 = vld [vmem:[%s1865_s9 + $0x1c0] sm:$0xff] }
 0x21b   :  { %v190_v8 = vmul.f32 %v1112_v61, %v186_v6  ;;  %v189_v9 = vmul.f32 %v1110_v60, %v185_v7  ;;  %v524_v60 = vld [vmem:[%s1865_s9 + $0x270] sm:$0xff]  ;;  %v521_v6 = vld [vmem:[%s1865_s9 + $0x258] sm:$0xff] }
 0x21c   :  { %v540_v61 = vld [vmem:[%s1865_s9 + $0x2f0] sm:$0xff]  ;;  %v537_v7 = vld [vmem:[%s1865_s9 + $0x2d8] sm:$0xff] }
 0x21d   :  { %321 = vperm.xlu1 %1094, %v190_v8   ;;  %193 = vperm.xlu0 %1096, %v189_v9   ;;  %v485_v8 = vld [vmem:[%s1865_s9 + $0x138] sm:$0xff] }
 0x21e   :  { %v501_v9 = vld [vmem:[%s1865_s9 + $0x1b8] sm:$0xff] }
 0x28f   :  { %v194_v10 = vpop.permute.xlu0 %193  ;;  %v322_v12 = vpop.permute.xlu1 %321 }
 0x290   :  { %v195_v11 = vperm.slane %v194_v10, %v147_v44  ;;  %v323_v13 = vperm.slane %v322_v12, %v147_v44  ;;  %v452_v44 = vld [vmem:[%s1865_s9 + $0x30] sm:$0xff] }
 0x291   :  { %v520_v10 = vld [vmem:[%s1865_s9 + $0x250] sm:$0xff] }
 0x292   :  { %1067 = vmatmul.msk.f32.vlgmr.msra.gmra.mxu0 %vm196_vm2, %v195_v11  ;;  %1068 = vmatmul.msk.f32.vlgmr.msra.gmra.mxu1 %vm196_vm2, %v195_v11  ;;  %v484_v12 = vld [vmem:[%s1865_s9 + $0x130] sm:$0xff] }
 0x293   :  { %1069 = vmatmul.msk.f32.vlgmr.msra.gmra.mxu2 %vm196_vm2, %v195_v11  ;;  %1070 = vmatmul.msk.f32.vlgmr.msra.gmra.mxu3 %vm196_vm2, %v195_v11 }
 0x294   :  { %381 = vmatpush.msra.mxu0 %v1315_v15  ;;  %401 = vmatpush.msra.mxu1 %v1320_v16  ;;  %v493_v15 = vld [vmem:[%s1865_s9 + $0x178] sm:$0xff] }
 0x295   :  { %421 = vmatpush.msra.mxu2 %v1327_v29  ;;  %441 = vmatpush.msra.mxu3 %v1333_v36  ;;  %v509_v16 = vld [vmem:[%s1865_s9 + $0x1f8] sm:$0xff]  ;;  %v506_v29 = vld [vmem:[%s1865_s9 + $0x1e0] sm:$0xff]  ;;  %v488_v36 = vld [vmem:[%s1865_s9 + $0x150] sm:$0xff] }
 0x29a   :  { %1071 = vmatmul.msk.f32.vlgmr.msrb.gmra.mxu0 %vm196_vm2, %v195_v11  ;;  %1072 = vmatmul.msk.f32.vlgmr.msrb.gmra.mxu1 %vm196_vm2, %v195_v11  ;;  %v536_v11 = vld [vmem:[%s1865_s9 + $0x2d0] sm:$0xff] }
 0x29b   :  { %1073 = vmatmul.msk.f32.vlgmr.msrb.gmra.mxu2 %vm196_vm2, %v323_v13  ;;  %1074 = vmatmul.msk.f32.vlgmr.msrb.gmra.mxu3 %vm196_vm2, %v323_v13 }
 0x29c   :  { %576 = vmatpush.msrb.mxu0 %v461_v14  ;;  %596 = vmatpush.msrb.mxu1 %v477_v17  ;;  %v519_v14 = vld [vmem:[%s1865_s9 + $0x248] sm:$0xff] }
 0x29d   :  { %616 = vmatpush.msrb.mxu2 %v493_v15  ;;  %636 = vmatpush.msrb.mxu3 %v509_v16  ;;  %v535_v17 = vld [vmem:[%s1865_s9 + $0x2c8] sm:$0xff] }
 0x29e   :  { %577 = vmatpush.msrb.mxu0 %v460_v18  ;;  %597 = vmatpush.msrb.mxu1 %v476_v19  ;;  %v483_v15 = vld [vmem:[%s1865_s9 + $0x128] sm:$0xff]  ;;  %v518_v18 = vld [vmem:[%s1865_s9 + $0x240] sm:$0xff] }
 0x29f   :  { %617 = vmatpush.msrb.mxu2 %v492_v20  ;;  %637 = vmatpush.msrb.mxu3 %v508_v21  ;;  %v499_v16 = vld [vmem:[%s1865_s9 + $0x1a8] sm:$0xff]  ;;  %v534_v19 = vld [vmem:[%s1865_s9 + $0x2c0] sm:$0xff] }
 0x2a0   :  { %578 = vmatpush.msrb.mxu0 %v459_v22  ;;  %598 = vmatpush.msrb.mxu1 %v475_v23  ;;  %v482_v20 = vld [vmem:[%s1865_s9 + $0x120] sm:$0xff]  ;;  %v517_v22 = vld [vmem:[%s1865_s9 + $0x238] sm:$0xff] }
 0x2a1   :  { %618 = vmatpush.msrb.mxu2 %v491_v24  ;;  %638 = vmatpush.msrb.mxu3 %v507_v25  ;;  %v498_v21 = vld [vmem:[%s1865_s9 + $0x1a0] sm:$0xff]  ;;  %v533_v23 = vld [vmem:[%s1865_s9 + $0x2b8] sm:$0xff] }
 0x2a2   :  { %1075 = vmatmul.msk.f32.vlgmr.msra.gmra.mxu0 %vm196_vm2, %v323_v13  ;;  %1076 = vmatmul.msk.f32.vlgmr.msra.gmra.mxu1 %vm196_vm2, %v323_v13  ;;  %v481_v24 = vld [vmem:[%s1865_s9 + $0x118] sm:$0xff] }
 0x2a3   :  { %1077 = vmatmul.msk.f32.vlgmr.msra.gmra.mxu2 %vm196_vm2, %v323_v13  ;;  %1078 = vmatmul.msk.f32.vlgmr.msra.gmra.mxu3 %vm196_vm2, %v323_v13  ;;  %v500_v13 = vld [vmem:[%s1865_s9 + $0x1b0] sm:$0xff]  ;;  %v497_v25 = vld [vmem:[%s1865_s9 + $0x198] sm:$0xff] }
 0x2a4   :  { %579 = vmatpush.msrb.mxu0 %v458_v26  ;;  %599 = vmatpush.msrb.mxu1 %v474_v27  ;;  %v516_v26 = vld [vmem:[%s1865_s9 + $0x230] sm:$0xff] }
 0x2a5   :  { %619 = vmatpush.msrb.mxu2 %v490_v28  ;;  %639 = vmatpush.msrb.mxu3 %v506_v29  ;;  %v532_v27 = vld [vmem:[%s1865_s9 + $0x2b0] sm:$0xff] }
 0x2a6   :  { %580 = vmatpush.msrb.mxu0 %v457_v30  ;;  %600 = vmatpush.msrb.mxu1 %v473_v31  ;;  %v480_v28 = vld [vmem:[%s1865_s9 + $0x110] sm:$0xff]  ;;  %v515_v30 = vld [vmem:[%s1865_s9 + $0x228] sm:$0xff] }
 0x2a7   :  { %620 = vmatpush.msrb.mxu2 %v489_v32  ;;  %640 = vmatpush.msrb.mxu3 %v505_v33  ;;  %v496_v29 = vld [vmem:[%s1865_s9 + $0x190] sm:$0xff]  ;;  %v531_v31 = vld [vmem:[%s1865_s9 + $0x2a8] sm:$0xff] }
 0x2a8   :  { %581 = vmatpush.msrb.mxu0 %v456_v34  ;;  %601 = vmatpush.msrb.mxu1 %v472_v35  ;;  %v479_v32 = vld [vmem:[%s1865_s9 + $0x108] sm:$0xff]  ;;  %v514_v34 = vld [vmem:[%s1865_s9 + $0x220] sm:$0xff] }
 0x2a9   :  { %621 = vmatpush.msrb.mxu2 %v488_v36  ;;  %641 = vmatpush.msrb.mxu3 %v504_v37  ;;  %v495_v33 = vld [vmem:[%s1865_s9 + $0x188] sm:$0xff]  ;;  %v530_v35 = vld [vmem:[%s1865_s9 + $0x2a0] sm:$0xff] }
 0x2aa   :  { %582 = vmatpush.msrb.mxu0 %v455_v38  ;;  %602 = vmatpush.msrb.mxu1 %v471_v39  ;;  %v478_v36 = vld [vmem:[%s1865_s9 + $0x100] sm:$0xff]  ;;  %v513_v38 = vld [vmem:[%s1865_s9 + $0x218] sm:$0xff] }
 0x2ab   :  { %622 = vmatpush.msrb.mxu2 %v487_v0  ;;  %642 = vmatpush.msrb.mxu3 %v503_v1  ;;  %v494_v37 = vld [vmem:[%s1865_s9 + $0x180] sm:$0xff]  ;;  %v529_v39 = vld [vmem:[%s1865_s9 + $0x298] sm:$0xff] }
 0x2ac   :  { %583 = vmatpush.msrb.mxu0 %v454_v40  ;;  %603 = vmatpush.msrb.mxu1 %v470_v41  ;;  %v512_v40 = vld [vmem:[%s1865_s9 + $0x210] sm:$0xff] }
 0x2ad   :  { %623 = vmatpush.msrb.mxu2 %v486_v4  ;;  %643 = vmatpush.msrb.mxu3 %v502_v5  ;;  %v528_v41 = vld [vmem:[%s1865_s9 + $0x290] sm:$0xff] }
 0x2ae   :  { %584 = vmatpush.msrb.mxu0 %v453_v42  ;;  %604 = vmatpush.msrb.mxu1 %v469_v43  ;;  %v511_v42 = vld [vmem:[%s1865_s9 + $0x208] sm:$0xff] }
 0x2af   :  { %624 = vmatpush.msrb.mxu2 %v485_v8  ;;  %644 = vmatpush.msrb.mxu3 %v501_v9  ;;  %v527_v43 = vld [vmem:[%s1865_s9 + $0x288] sm:$0xff]  ;;  %v696_v9 = vld [vmem:[%s1866_s3] sm:$0xff] }
 0x2b0   :  { %585 = vmatpush.msrb.mxu0 %v452_v44  ;;  %605 = vmatpush.msrb.mxu1 %v468_v45  ;;  %v510_v44 = vld [vmem:[%s1865_s9 + $0x200] sm:$0xff]  ;;  %v697_v8 = vld [vmem:[%s1866_s3 + $0x8] sm:$0xff] }
 0x2b1   :  { %625 = vmatpush.msrb.mxu2 %v484_v12  ;;  %645 = vmatpush.msrb.mxu3 %v500_v13  ;;  %v526_v45 = vld [vmem:[%s1865_s9 + $0x280] sm:$0xff] }
 0x2b2   :  { %586 = vmatpush.msrb.mxu0 %v451_v46  ;;  %606 = vmatpush.msrb.mxu1 %v467_v47  ;;  %v1097_v12 = vld [vmem:[%s1868_s2] ss:$0 sm:$0xff]  ;;  %s1144_s2 = smov [#allocation3]  }
 0x2b3   :  { %626 = vmatpush.msrb.mxu2 %v483_v15  ;;  %646 = vmatpush.msrb.mxu3 %v499_v16 }
 0x2b4   :  { %587 = vmatpush.msrb.mxu0 %v450_v48  ;;  %607 = vmatpush.msrb.mxu1 %v466_v49 }
 0x2b5   :  { %627 = vmatpush.msrb.mxu2 %v482_v20  ;;  %647 = vmatpush.msrb.mxu3 %v498_v21 }
 0x2b6   :  { %588 = vmatpush.msrb.mxu0 %v449_v50  ;;  %608 = vmatpush.msrb.mxu1 %v465_v51 }
 0x2b7   :  { %628 = vmatpush.msrb.mxu2 %v481_v24  ;;  %648 = vmatpush.msrb.mxu3 %v497_v25  ;;  %v730_v25 = vld [vmem:[%s1867_s29 + $0x8] sm:$0xff] }
 0x2b8   :  { %589 = vmatpush.msrb.mxu0 %v448_v52  ;;  %609 = vmatpush.msrb.mxu1 %v464_v53 }
 0x2b9   :  { %629 = vmatpush.msrb.mxu2 %v480_v28  ;;  %649 = vmatpush.msrb.mxu3 %v496_v29  ;;  %v763_v28 = vld [vmem:[%s1869_s28 + $0x10] sm:$0xff]  ;;  %v1098_v29 = vld [vmem:[%s1870_s11] ss:$0 sm:$0xff] }
 0x2ba   :  { %590 = vmatpush.msrb.mxu0 %v447_v54  ;;  %610 = vmatpush.msrb.mxu1 %v463_v55 }
 0x2bb   :  { %630 = vmatpush.msrb.mxu2 %v479_v32  ;;  %650 = vmatpush.msrb.mxu3 %v495_v33  ;;  %v762_v33 = vld [vmem:[%s1869_s28 + $0x8] sm:$0xff] }
 0x2bc   :  { %591 = vmatpush.msrb.mxu0 %v446_v56  ;;  %611 = vmatpush.msrb.mxu1 %v462_v57 }
 0x2bd   :  { %631 = vmatpush.msrb.mxu2 %v478_v36  ;;  %651 = vmatpush.msrb.mxu3 %v494_v37  ;;  %v795_v36 = vld [vmem:[%s1871_s8 + $0x10] sm:$0xff]  ;;  %v1099_v37 = vld [vmem:[%s1872_s1] ss:$0 sm:$0xff] }
 0x2be   :  { %656 = vmatpush.msra.mxu0 %v525_v58  ;;  %676 = vmatpush.msra.mxu1 %v541_v59 }
 0x2c0   :  { %657 = vmatpush.msra.mxu0 %v524_v60  ;;  %677 = vmatpush.msra.mxu1 %v540_v61 }
 0x2c2   :  { %658 = vmatpush.msra.mxu0 %v523_v62  ;;  %678 = vmatpush.msra.mxu1 %v539_v63 }
 0x2c4   :  { %659 = vmatpush.msra.mxu0 %v522_v2  ;;  %679 = vmatpush.msra.mxu1 %v538_v3 }
 0x2c6   :  { %660 = vmatpush.msra.mxu0 %v521_v6  ;;  %680 = vmatpush.msra.mxu1 %v537_v7  ;;  %v699_v6 = vld [vmem:[%s1866_s3 + $0x18] sm:$0xff]  ;;  %v698_v7 = vld [vmem:[%s1866_s3 + $0x10] sm:$0xff]  ;;  %s1058_s3 = sshll.u32 %s1843_s27, 4  ;;  %s1059_s3 = int_to_ptr.hbm [resolvable:$true] %s1058_s3 }
 0x2c7   :  { %720 = vmatpush.msra.mxu2 %v699_v6 }
 0x2c8   :  { %661 = vmatpush.msra.mxu0 %v520_v10  ;;  %681 = vmatpush.msra.mxu1 %v536_v11  ;;  %v732_v10 = vld [vmem:[%s1867_s29 + $0x18] sm:$0xff]  ;;  %v731_v11 = vld [vmem:[%s1867_s29 + $0x10] sm:$0xff] }
 0x2c9   :  { %721 = vmatpush.msra.mxu2 %v698_v7  ;;  %752 = vmatpush.msra.mxu3 %v732_v10  ;;  %v921_v10 = vld [vmem:[%s1835_s19] sm:$0xff] }
 0x2ca   :  { %662 = vmatpush.msra.mxu0 %v519_v14  ;;  %682 = vmatpush.msra.mxu1 %v535_v17 }
 0x2cb   :  { %722 = vmatpush.msra.mxu2 %v697_v8  ;;  %753 = vmatpush.msra.mxu3 %v731_v11  ;;  %v984_v11 = vld [vmem:[%s1839_s23 + $0x8] sm:$0xff] }
 0x2cc   :  { %663 = vmatpush.msra.mxu0 %v518_v18  ;;  %683 = vmatpush.msra.mxu1 %v534_v19 }
 0x2cd   :  { %723 = vmatpush.msra.mxu2 %v696_v9  ;;  %754 = vmatpush.msra.mxu3 %v730_v25  ;;  %v922_v9 = vld [vmem:[%s1835_s19 + $0x8] sm:$0xff]  ;;  %v1107_v25 = vld [vmem:[%s1840_s24] ss:$0 sm:$0xff]  ;;  %s1056_s24 = sshll.u32 %s1144_s2, 4  ;;  %s1057_s24 = int_to_ptr.vmem [resolvable:$true] %s1056_s24 }
 0x2ce   :  { %664 = vmatpush.msra.mxu0 %v517_v22  ;;  %684 = vmatpush.msra.mxu1 %v533_v23 }
 0x2d0   :  { %665 = vmatpush.msra.mxu0 %v516_v26  ;;  %685 = vmatpush.msra.mxu1 %v532_v27  ;;  %v729_v26 = vld [vmem:[%s1867_s29] sm:$0xff]  ;;  %v764_v27 = vld [vmem:[%s1869_s28 + $0x18] sm:$0xff] }
 0x2d1   :  { %755 = vmatpush.msra.mxu3 %v729_v26 }
 0x2d2   :  { %666 = vmatpush.msra.mxu0 %v515_v30  ;;  %686 = vmatpush.msra.mxu1 %v531_v31 }
 0x2d4   :  { %667 = vmatpush.msra.mxu0 %v514_v34  ;;  %687 = vmatpush.msra.mxu1 %v530_v35  ;;  %v761_v34 = vld [vmem:[%s1869_s28] sm:$0xff]  ;;  %v796_v35 = vld [vmem:[%s1871_s8 + $0x18] sm:$0xff] }
 0x2d6   :  { %668 = vmatpush.msra.mxu0 %v513_v38  ;;  %688 = vmatpush.msra.mxu1 %v529_v39 }
 0x2d8   :  { %669 = vmatpush.msra.mxu0 %v512_v40  ;;  %689 = vmatpush.msra.mxu1 %v528_v41  ;;  %v794_v41 = vld [vmem:[%s1871_s8 + $0x8] sm:$0xff] }
 0x2da   :  { %670 = vmatpush.msra.mxu0 %v511_v42  ;;  %690 = vmatpush.msra.mxu1 %v527_v43  ;;  %v793_v42 = vld [vmem:[%s1871_s8] sm:$0xff]  ;;  %v828_v43 = vld [vmem:[%s1829_s13 + $0x18] sm:$0xff] }
 0x2dc   :  { %671 = vmatpush.msra.mxu0 %v510_v44  ;;  %691 = vmatpush.msra.mxu1 %v526_v45  ;;  %v827_v44 = vld [vmem:[%s1829_s13 + $0x10] sm:$0xff]  ;;  %v1100_v45 = vld [vmem:[%s1873_s5] ss:$0 sm:$0xff] }
 0x30f   :  { %v216_v46 = vpop.f32.mrf.mxu0  ;;  %v236_v47 = vpop.f32.mrf.mxu1 }
 0x316   :  { %v256_v48 = vpop.f32.mrf.mxu2  ;;  %v276_v49 = vpop.f32.mrf.mxu3 }
 0x317   :  { %v296_v50 = vpop.f32.mrf.mxu0  ;;  %v316_v51 = vpop.f32.mrf.mxu1 }
 0x31e   :  { %v343_v52 = vpop.f32.mrf.mxu2  ;;  %v363_v53 = vpop.f32.mrf.mxu3 }
 0x31f   :  { %v558_v54 = vrot.slane %v343_v52, 7  ;;  %v560_v55 = vrot.slane %v363_v53, 7  ;;  %v383_v56 = vpop.f32.mrf.mxu0  ;;  %v403_v57 = vpop.f32.mrf.mxu1  ;;  %v859_v52 = vld [vmem:[%s1831_s15 + $0x10] sm:$0xff]  ;;  %v1101_v53 = vld [vmem:[%s1828_s12] ss:$0 sm:$0xff] }
 0x320   :  { %v562_v58 = vrot.slane %v383_v56, 7  ;;  %v564_v59 = vrot.slane %v403_v57, 7  ;;  %v858_v57 = vld [vmem:[%s1831_s15 + $0x8] sm:$0xff] }
 0x321   :  { %v559_v60 = vsel %vm150_vm0, %v558_v54, %v216_v46  ;;  %v561_v61 = vsel %vm150_vm0, %v560_v55, %v236_v47 }
 0x322   :  { %592 = vmatmul.f32.vlgmr.msrb.gmra.mxu0 %v559_v60  ;;  %612 = vmatmul.f32.vlgmr.msrb.gmra.mxu1 %v561_v61  ;;  %v563_v62 = vsel %vm150_vm0, %v562_v58, %v256_v48  ;;  %v565_v63 = vsel %vm150_vm0, %v564_v59, %v276_v49  ;;  %v826_v49 = vld [vmem:[%s1829_s13 + $0x8] sm:$0xff]  ;;  %v857_v58 = vld [vmem:[%s1831_s15] sm:$0xff]  ;;  %v892_v59 = vld [vmem:[%s1833_s17 + $0x18] sm:$0xff] }
 0x323   :  { %632 = vmatmul.f32.vlgmr.msrb.gmra.mxu2 %v563_v62  ;;  %652 = vmatmul.f32.vlgmr.msrb.gmra.mxu3 %v565_v63  ;;  %v891_v60 = vld [vmem:[%s1833_s17 + $0x10] sm:$0xff]  ;;  %v1102_v61 = vld [vmem:[%s1830_s14] ss:$0 sm:$0xff] }
 0x324   :  { %784 = vmatpush.msrb.mxu2 %v764_v27  ;;  %816 = vmatpush.msrb.mxu3 %v796_v35 }
 0x325   :  { %1003 = vmatpush.msrb.mxu1 %v984_v11 }
 0x326   :  { %v423_v0 = vpop.f32.mrf.mxu2  ;;  %v443_v1 = vpop.f32.mrf.mxu3  ;;  %785 = vmatpush.msrb.mxu2 %v763_v28  ;;  %817 = vmatpush.msrb.mxu3 %v795_v36 }
 0x327   :  { %v566_v2 = vrot.slane %v423_v0, 7  ;;  %v568_v3 = vrot.slane %v443_v1, 7  ;;  %v890_v1 = vld [vmem:[%s1833_s17 + $0x8] sm:$0xff] }
 0x328   :  { %786 = vmatpush.msrb.mxu2 %v762_v33  ;;  %818 = vmatpush.msrb.mxu3 %v794_v41 }
 0x329   :  { %v567_v4 = vsel %vm150_vm0, %v566_v2, %v296_v50  ;;  %v569_v5 = vsel %vm150_vm0, %v568_v3, %v316_v51  ;;  %v825_v50 = vld [vmem:[%s1829_s13] sm:$0xff]  ;;  %v860_v51 = vld [vmem:[%s1831_s15 + $0x18] sm:$0xff] }
 0x32a   :  { %672 = vmatmul.f32.vlgmr.msra.gmra.mxu0 %v567_v4  ;;  %692 = vmatmul.f32.vlgmr.msra.gmra.mxu1 %v569_v5  ;;  %v889_v2 = vld [vmem:[%s1833_s17] sm:$0xff]  ;;  %v924_v3 = vld [vmem:[%s1835_s19 + $0x18] sm:$0xff]  ;;  %v923_v4 = vld [vmem:[%s1835_s19 + $0x10] sm:$0xff] }
 0x32b   :  { %787 = vmatpush.msrb.mxu2 %v761_v34  ;;  %819 = vmatpush.msrb.mxu3 %v793_v42  ;;  %v1103_v5 = vld [vmem:[%s1832_s16] ss:$0 sm:$0xff] }
 0x39f   :  { %v593_v13 = vpop.f32.mrf.mxu0  ;;  %v613_v17 = vpop.f32.mrf.mxu1 }
 0x3a0   :  { %v594_v14 = vadd.f32 %v1097_v12, %v593_v13  ;;  %v1104_v12 = vld [vmem:[%s1834_s18] ss:$0 sm:$0xff] }
 0x3a2   :  { %v614_v15 = vadd.f32 %v613_v17, %v594_v14 }
 0x3a6   :  { %v633_v16 = vpop.f32.mrf.mxu2  ;;  %v653_v19 = vpop.f32.mrf.mxu3 }
 0x3a7   :  { %v634_v18 = vadd.f32 %v633_v16, %v614_v15  ;;  %v673_v21 = vpop.f32.mrf.mxu0  ;;  %v693_v23 = vpop.f32.mrf.mxu1  ;;  %v954_v15 = vld [vmem:[%s1837_s21 + $0x8] sm:$0xff]  ;;  %v983_v16 = vld [vmem:[%s1839_s23] sm:$0xff] }
 0x3a8   :  { %977 = vmatpush.msrb.mxu0 %v954_v15  ;;  %1004 = vmatpush.msrb.mxu1 %v983_v16 }
 0x3a9   :  { %v654_v20 = vadd.f32 %v653_v19, %v634_v18  ;;  %v953_v18 = vld [vmem:[%s1837_s21] sm:$0xff] }
 0x3aa   :  { %978 = vmatpush.msrb.mxu0 %v953_v18  ;;  %v1010_v19 = vld [vmem:[%s1841_s25] sm:$0xff] }
 0x3ab   :  { %v674_v22 = vadd.f32 %v673_v21, %v654_v20  ;;  %v1105_v20 = vld [vmem:[%s1836_s20] ss:$0 sm:$0xff]  ;;  %s1142_s20 = smov 16  }
 0x3ad   :  { %v694_v24 = vadd.f32 %v693_v23, %v674_v22 }
 0x3af   :  { %1079 = vmatmul.msk.f32.vlgmr.msra.gmra.mxu2 %vm704_vm3, %v694_v24  ;;  %v1106_v24 = vld [vmem:[%s1838_s22] ss:$0 sm:$0xff]  ;;  %s1143_s22 = smov 32  }
 0x3b0   :  { %848 = vmatpush.msra.mxu2 %v828_v43 }
 0x3b2   :  { %849 = vmatpush.msra.mxu2 %v827_v44 }
 0x3b4   :  { %850 = vmatpush.msra.mxu2 %v826_v49 }
 0x3b6   :  { %851 = vmatpush.msra.mxu2 %v825_v50 }
 0x432   :  { %v725_v30 = vpop.f32.mrf.mxu2 }
 0x433   :  { %v726_v31 = vadd.f32 %v1098_v29, %v725_v30 }
 0x435   :  { %v728_v32 = vmax.f32 %v726_v31, 0.0  ;;  %v1108_v31 = vld [vmem:[%s1842_s26] ss:$0 sm:$0xff] }
 0x437   :  { %1080 = vmatmul.msk.f32.vlgmr.msra.gmra.mxu3 %vm704_vm3, %v728_v32 }
 0x438   :  { %880 = vmatpush.msra.mxu3 %v860_v51 }
 0x43a   :  { %881 = vmatpush.msra.mxu3 %v859_v52 }
 0x43c   :  { %882 = vmatpush.msra.mxu3 %v858_v57 }
 0x43e   :  { %883 = vmatpush.msra.mxu3 %v857_v58 }
 0x4ba   :  { %v757_v38 = vpop.f32.mrf.mxu3 }
 0x4bb   :  { %v758_v39 = vadd.f32 %v1099_v37, %v757_v38 }
 0x4bd   :  { %v760_v40 = vmax.f32 %v758_v39, 0.0 }
 0x4bf   :  { %1081 = vmatmul.msk.f32.vlgmr.msrb.gmra.mxu2 %vm704_vm3, %v760_v40 }
 0x4c0   :  { %912 = vmatpush.msrb.mxu2 %v892_v59 }
 0x4c2   :  { %913 = vmatpush.msrb.mxu2 %v891_v60 }
 0x4c4   :  { %914 = vmatpush.msrb.mxu2 %v890_v1 }
 0x4c6   :  { %915 = vmatpush.msrb.mxu2 %v889_v2 }
 0x542   :  { %v789_v46 = vpop.f32.mrf.mxu2 }
 0x543   :  { %v790_v47 = vadd.f32 %v1100_v45, %v789_v46 }
 0x545   :  { %v792_v48 = vmax.f32 %v790_v47, 0.0 }
 0x547   :  { %1082 = vmatmul.msk.f32.vlgmr.msrb.gmra.mxu3 %vm704_vm3, %v792_v48 }
 0x548   :  { %944 = vmatpush.msrb.mxu3 %v924_v3 }
 0x54a   :  { %945 = vmatpush.msrb.mxu3 %v923_v4 }
 0x54c   :  { %946 = vmatpush.msrb.mxu3 %v922_v9 }
 0x54e   :  { %947 = vmatpush.msrb.mxu3 %v921_v10 }
 0x5ca   :  { %v821_v54 = vpop.f32.mrf.mxu3 }
 0x5cb   :  { %v822_v55 = vadd.f32 %v1101_v53, %v821_v54 }
 0x5cd   :  { %v824_v56 = vmax.f32 %v822_v55, 0.0 }
 0x5cf   :  { %1083 = vmatmul.msk.f32.vlgmr.msra.gmra.mxu2 %vm704_vm3, %v824_v56 }
 0x5d0   :  { %1033 = vmatpush.msra.mxu2 %v1010_v19 }
 0x652   :  { %v853_v62 = vpop.f32.mrf.mxu2 }
 0x653   :  { %v854_v63 = vadd.f32 %v1102_v61, %v853_v62 }
 0x655   :  { %v856_v0 = vmax.f32 %v854_v63, 0.0 }
 0x657   :  { %1084 = vmatmul.msk.f32.vlgmr.msra.gmra.mxu3 %vm704_vm3, %v856_v0 }
 0x6da   :  { %v885_v6 = vpop.f32.mrf.mxu3 }
 0x6db   :  { %v886_v7 = vadd.f32 %v1103_v5, %v885_v6 }
 0x6dd   :  { %v888_v8 = vmax.f32 %v886_v7, 0.0 }
 0x6df   :  { %1085 = vmatmul.msk.f32.vlgmr.msrb.gmra.mxu2 %vm704_vm3, %v888_v8 }
 0x762   :  { %v917_v13 = vpop.f32.mrf.mxu2 }
 0x763   :  { %v918_v14 = vadd.f32 %v1104_v12, %v917_v13 }
 0x765   :  { %v920_v17 = vmax.f32 %v918_v14, 0.0 }
 0x767   :  { %1086 = vmatmul.msk.f32.vlgmr.msrb.gmra.mxu3 %vm704_vm3, %v920_v17 }
 0x7ea   :  { %v949_v21 = vpop.f32.mrf.mxu3 }
 0x7eb   :  { %v950_v22 = vadd.f32 %v1105_v20, %v949_v21 }
 0x7ed   :  { %v952_v23 = vmax.f32 %v950_v22, 0.0 }
 0x7ef   :  { %1087 = vmatmul.msk.f32.vlgmr.msrb.gmra.mxu0 %vm959_vm4, %v952_v23  ;;  %1088 = vmatmul.msk.f32.vlgmr.msrb.gmra.mxu1 %vm959_vm4, %v952_v23 }
 0x86c   :  { %v980_v26 = vpop.f32.mrf.mxu0  ;;  %v1006_v27 = vpop.f32.mrf.mxu1 }
 0x86d   :  { %v981_v28 = vadd.f32 %v1106_v24, %v980_v26  ;;  %v1007_v29 = vadd.f32 %v1107_v25, %v1006_v27 }
 0x86f   :  { %v1009_v30 = vmax.f32 %v1007_v29, 0.0  ;;  %1039 = vrot.lane.b32.xlu1 %v981_v28, %s1142_s20 }
 0x871   :  { %1089 = vmatmul.msk.f32.vlgmr.msra.gmra.mxu2 %vm196_vm2, %v1009_v30 }
 0x8e1   :  { %v1040_v34 = vpop.permute.xlu1 %1039 }
 0x8e2   :  { %v1046_v35 = vsel %vm959_vm4, %v950_v22, %v1040_v34 }
 0x8f4   :  { %v1035_v32 = vpop.f32.mrf.mxu2 }
 0x8f5   :  { %v1036_v33 = vadd.f32 %v1108_v31, %v1035_v32 }
 0x8f7   :  { %1043 = vrot.lane.b32.xlu1 %v1036_v33, %s1143_s22 }
 0x969   :  { %v1044_v36 = vpop.permute.xlu1 %1043 }
 0x96a   :  { %v1047_v37 = vsel %vm704_vm3, %v1046_v35, %v1044_v36 }
 0x96b   :  { %v1049_v38 = vsel %vm1048_vm5, %v1047_v37, 0.0 }
 0x96c   :  { %1050 = vst [vmem:[#allocation3] sm:$0x3] %v1049_v38 }
 0x96d   :  { %1061 = dma.vmem_to_hbm [thread:$0]  %s1057_s24, 32, %s1059_s3, [#allocation4]  }
 0x96e   :  { %1139 = dma.done.wait [#allocation4], 32  }
 0x96f   :  { %1140 = vsyncadd [#allocation4], 4294967264 }
 0x970   :  { %1066 = vsyncpa [#allocation4], 1 }

</bundles_post_ra>
